<compile_context>
chip_gen: v5e
topology: v5e:2x2
jax: 0.10.0
libtpu: 0.0.40
codegen_flags: <defaults>
</compile_context>

<pallas_src>
import functools

import jax
import jax.numpy as jnp
from jax import lax
from jax.experimental import pallas as pl
from jax.experimental.pallas import tpu as pltpu


# ----------------------------------------------------------------------------
# Pallas kernel: mode-batched complex channel mixing on the MXU.
#   x_ref : (2, tile_m, B,   Cin )   real/imag planes
#   w_ref : (2, tile_m, Cin, Cout)
#   o_ref : (2, tile_m, B,   Cout)
# ----------------------------------------------------------------------------
def _spectral_contract_kernel(x_ref, w_ref, o_ref):
    xr = x_ref[0]            # (tile_m, B, Cin)
    xi = x_ref[1]
    wr = w_ref[0]            # (tile_m, Cin, Cout)
    wi = w_ref[1]

    # batch dim = modes (leading), contraction dim = Cin
    dn = (((2,), (1,)), ((0,), (0,)))

    def bmm(a, b):
        return lax.dot_general(a, b, dimension_numbers=dn,
                               preferred_element_type=jnp.float32)

    # Karatsuba 3-multiply complex product:
    #   k1 = (xr + xi) @ wr ;  k2 = xr @ (wi - wr) ;  k3 = xi @ (wr + wi)
    #   re = k1 - k3 ;  im = k1 + k2
    k1 = bmm(xr + xi, wr)
    k2 = bmm(xr, wi - wr)
    k3 = bmm(xi, wr + wi)

    o_ref[0] = k1 - k3
    o_ref[1] = k1 + k2


def spectral_contract(xf, wf, *, tile_m=None):
    """xf: (2, M, B, Cin) f32, wf: (2, M, Cin, Cout) f32 -> (2, M, B, Cout)."""
    _, M, B, Cin = xf.shape
    Cout = wf.shape[-1]

    if tile_m is None:
        # Bound per-step VMEM (double-buffered) while giving >=2 grid steps
        # (-> both v7x TensorCores) once M grows past the tile.
        tile_m = min(M, 128)
    n_tiles = pl.cdiv(M, tile_m)
    Mp = n_tiles * tile_m
    if Mp != M:
        pad = Mp - M
        xf = jnp.pad(xf, ((0, 0), (0, pad), (0, 0), (0, 0)))
        wf = jnp.pad(wf, ((0, 0), (0, pad), (0, 0), (0, 0)))

    x_spec = pl.BlockSpec((2, tile_m, B, Cin), lambda j: (0, j, 0, 0))
    w_spec = pl.BlockSpec((2, tile_m, Cin, Cout), lambda j: (0, j, 0, 0))
    o_spec = pl.BlockSpec((2, tile_m, B, Cout), lambda j: (0, j, 0, 0))

    out = pl.pallas_call(
        _spectral_contract_kernel,
        out_shape=jax.ShapeDtypeStruct((2, Mp, B, Cout), jnp.float32),
        grid=(n_tiles,),
        in_specs=[x_spec, w_spec],
        out_specs=o_spec,
        compiler_params=pltpu.CompilerParams(
            dimension_semantics=("parallel",),
            vmem_limit_bytes=32 * 1024 * 1024),
    )(xf, wf)

    if Mp != M:
        out = out[:, :M]
    return out


# ----------------------------------------------------------------------------
# FactorizedSpectralConv1d forward (implementation='reconstructed',
# separable=False: contraction uses the dense reconstructed complex weight).
# ----------------------------------------------------------------------------
def factorized_spectral_conv1d_forward(x, weights, bias, half_modes_height,
                                       fft_norm="backward", indices=0):
    """
    x       : (B, Cin, W) float32
    weights : complex64 (n_layers, Cin, Cout, hm)   (reconstructed dense weight)
    bias    : float32 (n_layers, Cout, 1) or None
    """
    B, Cin, W = x.shape
    hm = half_modes_height
    Cout = weights.shape[2]
    Wf = W // 2 + 1

    # rFFT over the last dim (glue, not Pallas).
    x_fft = jnp.fft.rfft(x.astype(jnp.float32), norm=fft_norm)   # (B, Cin, Wf)

    # Kept low-frequency modes, re-laid out mode-major for the batched matmul.
    xk = x_fft[:, :, :hm]                                 # (B, Cin, hm) complex
    xk = jnp.transpose(xk, (2, 0, 1))                     # (hm, B, Cin)
    xf = jnp.stack([jnp.real(xk), jnp.imag(xk)], axis=0).astype(jnp.float32)

    w = weights[indices]                                  # (Cin, Cout, hm)
    w = jnp.transpose(w, (2, 0, 1))                       # (hm, Cin, Cout)
    wf = jnp.stack([jnp.real(w), jnp.imag(w)], axis=0).astype(jnp.float32)

    of = spectral_contract(xf, wf)                        # (2, hm, B, Cout)
    out_k = (of[0] + 1j * of[1]).astype(jnp.complex64)    # (hm, B, Cout)
    out_k = jnp.transpose(out_k, (1, 2, 0))               # (B, Cout, hm)

    # Scatter into the zero-initialized output spectrum, inverse FFT.
    out_fft = jnp.zeros((B, Cout, Wf), jnp.complex64)
    out_fft = out_fft.at[:, :, :hm].set(out_k)
    y = jnp.fft.irfft(out_fft, n=W, norm=fft_norm).astype(jnp.float32)

    if bias is not None:
        y = y + bias[indices]                             # (Cout, 1) broadcast
    return y


# Pure-JAX reference of the same math (correctness check).
def _reference_forward(x, weights, bias, half_modes_height,
                       fft_norm="backward", indices=0):
    B, Cin, W = x.shape
    hm = half_modes_height
    Cout = weights.shape[2]
    Wf = W // 2 + 1
    x_fft = jnp.fft.rfft(x.astype(jnp.float32), norm=fft_norm)
    out_fft = jnp.zeros((B, Cout, Wf), jnp.complex64)
    out_fft = out_fft.at[:, :, :hm].set(
        jnp.einsum("bix,iox->box", x_fft[:, :, :hm], weights[indices]))
    y = jnp.fft.irfft(out_fft, n=W, norm=fft_norm)
    if bias is not None:
        y = y + bias[indices]
    return y.astype(jnp.float32)


if __name__ == "__main__":
    # Module hyper-parameters (1D FNO spectral conv).
    in_channels, out_channels = 4, 4
    modes_height = 8
    half_modes_height = modes_height // 2          # 4 kept modes
    n_layers = 1
    scale = 1.0 / (in_channels * out_channels)

    B, W = 2, 16

    key = jax.random.PRNGKey(0)
    kx, kwr, kwi, kb = jax.random.split(key, 4)

    x = jax.random.normal(kx, (B, in_channels, W), dtype=jnp.float32)

    # Deterministic synthetic init of the reconstructed complex spectral
    # weights, shape (n_layers, Cin, Cout, hm) with std = scale.
    # TODO(synk): the CP/Tucker/TT factorized parametrization itself is not
    # reproduced; 'reconstructed' uses the dense weight, initialized directly.
    w_shape = (n_layers, in_channels, out_channels, half_modes_height)
    w_real = scale * jax.random.normal(kwr, w_shape, dtype=jnp.float32)
    w_imag = scale * jax.random.normal(kwi, w_shape, dtype=jnp.float32)
    weights = (w_real + 1j * w_imag).astype(jnp.complex64)

    bias = scale * jax.random.normal(
        kb, (n_layers, out_channels, 1), dtype=jnp.float32)

    fwd = jax.jit(functools.partial(
        factorized_spectral_conv1d_forward,
        half_modes_height=half_modes_height, fft_norm="backward", indices=0))

    y = fwd(x, weights, bias)
    y = jax.block_until_ready(y)

    y_ref = _reference_forward(x, weights, bias, half_modes_height,
                               fft_norm="backward", indices=0)
    y_ref = jax.block_until_ready(y_ref)

    assert y.shape == (B, out_channels, W), y.shape
    assert jnp.allclose(y, y_ref, atol=1e-5, rtol=1e-5), \
        float(jnp.max(jnp.abs(y - y_ref)))

    print("KERNEL_OK")
</pallas_src>

<mosaic_0001>
module attributes {stable_mosaic.version = 11 : i64} {
  func.func @_spectral_contract_kernel(%arg0: i32, %arg1: memref<2x4x2x4xf32, #tpu.memory_space<vmem>>, %arg2: memref<2x4x4x4xf32, #tpu.memory_space<vmem>>, %arg3: memref<2x4x2x4xf32, #tpu.memory_space<vmem>>) attributes {dimension_semantics = [#tpu.dimension_semantics<parallel>], iteration_bounds = array<i64: 1>, scalar_prefetch = 0 : i64, scratch_operands = 0 : i64, tpu.core_type = #tpu.core_type<tc>, window_params = [{transform_indices = @transform_0, window_bounds = array<i64: 2, 4, 2, 4>}, {transform_indices = @transform_1, window_bounds = array<i64: 2, 4, 4, 4>}, {transform_indices = @transform_2, window_bounds = array<i64: 2, 4, 2, 4>}]} {
    %c0 = arith.constant 0 : index
    %c0_0 = arith.constant 0 : index
    %c0_1 = arith.constant 0 : index
    %c0_2 = arith.constant 0 : index
    %0 = vector.load %arg1[%c0, %c0_0, %c0_1, %c0_2] : memref<2x4x2x4xf32, #tpu.memory_space<vmem>>, vector<1x4x2x4xf32>
    %1 = vector.shape_cast %0 : vector<1x4x2x4xf32> to vector<4x2x4xf32>
    %c1 = arith.constant 1 : index
    %c0_3 = arith.constant 0 : index
    %c0_4 = arith.constant 0 : index
    %c0_5 = arith.constant 0 : index
    %2 = vector.load %arg1[%c1, %c0_3, %c0_4, %c0_5] : memref<2x4x2x4xf32, #tpu.memory_space<vmem>>, vector<1x4x2x4xf32>
    %3 = vector.shape_cast %2 : vector<1x4x2x4xf32> to vector<4x2x4xf32>
    %c0_6 = arith.constant 0 : index
    %c0_7 = arith.constant 0 : index
    %c0_8 = arith.constant 0 : index
    %c0_9 = arith.constant 0 : index
    %4 = vector.load %arg2[%c0_6, %c0_7, %c0_8, %c0_9] : memref<2x4x4x4xf32, #tpu.memory_space<vmem>>, vector<1x4x4x4xf32>
    %5 = vector.shape_cast %4 : vector<1x4x4x4xf32> to vector<4x4x4xf32>
    %c1_10 = arith.constant 1 : index
    %c0_11 = arith.constant 0 : index
    %c0_12 = arith.constant 0 : index
    %c0_13 = arith.constant 0 : index
    %6 = vector.load %arg2[%c1_10, %c0_11, %c0_12, %c0_13] : memref<2x4x4x4xf32, #tpu.memory_space<vmem>>, vector<1x4x4x4xf32>
    %7 = vector.shape_cast %6 : vector<1x4x4x4xf32> to vector<4x4x4xf32>
    %8 = arith.addf %1, %3 : vector<4x2x4xf32>
    %cst = arith.constant dense<0.000000e+00> : vector<4x2x4xf32>
    %9 = tpu.matmul %8, %5, %cst {dimension_numbers = #tpu.dot_dimension_numbers<[2], [1], [1], [2], [0, 0, 0, 1, 1, 2], [0], [0]>} : vector<4x2x4xf32>, vector<4x4x4xf32>, vector<4x2x4xf32> -> vector<4x2x4xf32>
    %10 = arith.subf %7, %5 : vector<4x4x4xf32>
    %cst_14 = arith.constant dense<0.000000e+00> : vector<4x2x4xf32>
    %11 = tpu.matmul %1, %10, %cst_14 {dimension_numbers = #tpu.dot_dimension_numbers<[2], [1], [1], [2], [0, 0, 0, 1, 1, 2], [0], [0]>} : vector<4x2x4xf32>, vector<4x4x4xf32>, vector<4x2x4xf32> -> vector<4x2x4xf32>
    %12 = arith.addf %5, %7 : vector<4x4x4xf32>
    %cst_15 = arith.constant dense<0.000000e+00> : vector<4x2x4xf32>
    %13 = tpu.matmul %3, %12, %cst_15 {dimension_numbers = #tpu.dot_dimension_numbers<[2], [1], [1], [2], [0, 0, 0, 1, 1, 2], [0], [0]>} : vector<4x2x4xf32>, vector<4x4x4xf32>, vector<4x2x4xf32> -> vector<4x2x4xf32>
    %14 = arith.subf %9, %13 : vector<4x2x4xf32>
    %c0_16 = arith.constant 0 : index
    %c0_17 = arith.constant 0 : index
    %c0_18 = arith.constant 0 : index
    %c0_19 = arith.constant 0 : index
    %15 = vector.load %arg3[%c0_16, %c0_17, %c0_18, %c0_19] : memref<2x4x2x4xf32, #tpu.memory_space<vmem>>, vector<1x4x2x4xf32>
    %16 = vector.shape_cast %15 : vector<1x4x2x4xf32> to vector<4x2x4xf32>
    %17 = vector.shape_cast %14 : vector<4x2x4xf32> to vector<1x4x2x4xf32>
    tpu.vector_store %arg3[%c0_16, %c0_17, %c0_18, %c0_19], %17 {strides = array<i32>} : memref<2x4x2x4xf32, #tpu.memory_space<vmem>>, vector<1x4x2x4xf32>,
    %18 = arith.addf %9, %11 : vector<4x2x4xf32>
    %c1_20 = arith.constant 1 : index
    %c0_21 = arith.constant 0 : index
    %c0_22 = arith.constant 0 : index
    %c0_23 = arith.constant 0 : index
    %19 = vector.load %arg3[%c1_20, %c0_21, %c0_22, %c0_23] : memref<2x4x2x4xf32, #tpu.memory_space<vmem>>, vector<1x4x2x4xf32>
    %20 = vector.shape_cast %19 : vector<1x4x2x4xf32> to vector<4x2x4xf32>
    %21 = vector.shape_cast %18 : vector<4x2x4xf32> to vector<1x4x2x4xf32>
    tpu.vector_store %arg3[%c1_20, %c0_21, %c0_22, %c0_23], %21 {strides = array<i32>} : memref<2x4x2x4xf32, #tpu.memory_space<vmem>>, vector<1x4x2x4xf32>,
    return
  }
  func.func @transform_0(%arg0: i32) -> (i32, i32, i32, i32) {
    %c0_i32 = arith.constant 0 : i32
    %c0_i32_0 = arith.constant 0 : i32
    %c0_i32_1 = arith.constant 0 : i32
    %c0_i32_2 = arith.constant 0 : i32
    return %c0_i32, %arg0, %c0_i32_0, %c0_i32_1 : i32, i32, i32, i32
  }
  func.func @transform_1(%arg0: i32) -> (i32, i32, i32, i32) {
    %c0_i32 = arith.constant 0 : i32
    %c0_i32_0 = arith.constant 0 : i32
    %c0_i32_1 = arith.constant 0 : i32
    %c0_i32_2 = arith.constant 0 : i32
    return %c0_i32, %arg0, %c0_i32_0, %c0_i32_1 : i32, i32, i32, i32
  }
  func.func @transform_2(%arg0: i32) -> (i32, i32, i32, i32) {
    %c0_i32 = arith.constant 0 : i32
    %c0_i32_0 = arith.constant 0 : i32
    %c0_i32_1 = arith.constant 0 : i32
    %c0_i32_2 = arith.constant 0 : i32
    return %c0_i32, %arg0, %c0_i32_0, %c0_i32_1 : i32, i32, i32, i32
  }
}

</mosaic_0001>

<bundles_post_ra>
// kernel: custom-call.1
= control target key start
LH: loop header
LB: loop body
LE: loop exit
PB: predicated region body
PF: predicated region fallthrough
CT: control target
= control target key end

     0   :  { %s56_s0 = inlined_call_operand.hbm [shape: c64[1,4,4,4], index: 0, kind: input, shape index: {}]   ;;  %s57_s1 = inlined_call_operand.vmem [shape: f32[1,4,4,4], index: 1, kind: output, shape index: {}]  }
   0x1   :  { %s2_s8 = scalar_lea.hbm %s56_s0, 16 }
   0x2   :  { %3 = vsyncpa [#allocation0], 0  ;;  %s5_s9 = sshll.u32 %s2_s8, 4  ;;  %s7_s12 = sshll.u32 %s57_s1, 4  ;;  %s6_s9 = int_to_ptr.hbm [resolvable:$true] %s5_s9  ;;  %s8_s12 = int_to_ptr.vmem [resolvable:$true] %s7_s12 }
   0x3   :  { %10 = dma.hbm_to_vmem [thread:$0]  %s6_s9, 256, %s8_s12, [#allocation0] }
   0x4   :  { %38 = dma.done.wait [#allocation0], 256  }
   0x5   :  { %39 = vsyncadd [#allocation0], 4294967040 }
   0x6   :  { %13 = vsyncpa [#allocation0], 1 }

// kernel: custom-call
= control target key start
LH: loop header
LB: loop body
LE: loop exit
PB: predicated region body
PF: predicated region fallthrough
CT: control target
= control target key end

     0   :  { %2 = vsyncpa [#allocation0], 0  ;;  %s55_s0 = inlined_call_operand.hbm [shape: c64[1,4,4,4], index: 0, kind: input, shape index: {}]   ;;  %s56_s1 = inlined_call_operand.vmem [shape: f32[1,4,4,4], index: 1, kind: output, shape index: {}]  }
   0x1   :  { %s4_s8 = sshll.u32 %s55_s0, 4  ;;  %s6_s11 = sshll.u32 %s56_s1, 4  ;;  %s5_s8 = int_to_ptr.hbm [resolvable:$true] %s4_s8  ;;  %s7_s11 = int_to_ptr.vmem [resolvable:$true] %s6_s11 }
   0x2   :  { %9 = dma.hbm_to_vmem [thread:$0]  %s5_s8, 256, %s7_s11, [#allocation0] }
   0x3   :  { %37 = dma.done.wait [#allocation0], 256  }
   0x4   :  { %38 = vsyncadd [#allocation0], 4294967040 }
   0x5   :  { %12 = vsyncpa [#allocation0], 1 }

// kernel: reverse.1
= control target key start
LH: loop header
LB: loop body
LE: loop exit
PB: predicated region body
PF: predicated region fallthrough
CT: control target
= control target key end

     0   :  { %v2_v0 = vlaneseq  ;;  %s152_s0 = inlined_call_operand.vmem [shape: f32[2,4,7], index: 0, kind: input, shape index: {}]   ;;  %s153_s1 = inlined_call_operand.vmem [shape: f32[2,4,7], index: 1, kind: output, shape index: {}]  }
   0x2   :  { %v3_v1 = vsub.s32 6, %v2_v0 }
   0x4   :  { %4 = vset.pattern.permute.xlu0 %v3_v1 }
   0x5   :  { %v21_v2 = vld [vmem:[%s152_s0] sm:$0xff]  }
   0x6   :  { %22 = vst [vmem:[#allocation1] sm:$0xff] %v21_v2  }
   0xd   :  { %v56_v3 = vld [vmem:[#allocation1] sm:$0xf]  ;;  %v53_v4 = vld [vmem:[#allocation1 + $0x4] sm:$0xf] }
   0xe   :  { %57 = vst [vmem:[#allocation0] sm:$0xf] %v56_v3 }
   0xf   :  { %55 = vst [vmem:[#allocation0 + $0x8] sm:$0xf] %v53_v4 }
  0x15   :  { %v58_v5 = vld [vmem:[#allocation0] sm:$0xff] }
  0x16   :  { %59 = vperm.xlu0 %4, %v58_v5   ;;  %v64_v6 = vld [vmem:[#allocation0 + $0x8] sm:$0xff] }
  0x1e   :  { %65 = vperm.xlu0 %4, %v64_v6  }
  0x88   :  { %v60_v7 = vpop.permute.xlu0 %59 }
  0x89   :  { %61 = vst [vmem:[#allocation2 + $0x8] sm:$0xff] %v60_v7 }
  0x90   :  { %v70_v8 = vld [vmem:[#allocation2 + $0x8] sm:$0xf]  ;;  %v66_v9 = vpop.permute.xlu0 %65 }
  0x91   :  { %73 = vst [vmem:[#allocation3] sm:$0xf] %v70_v8 }
  0x92   :  { %67 = vst [vmem:[#allocation2] sm:$0xff] %v66_v9 }
  0x98   :  { %v96_v10 = vld [vmem:[#allocation3] sm:$0xf] }
  0x99   :  { %97 = vst [vmem:[%s153_s1] sm:$0xf] %v96_v10  ;;  %v75_v11 = vld [vmem:[#allocation2] sm:$0xf] }
  0x9a   :  { %79 = vst [vmem:[#allocation3 + $0x4] sm:$0xf] %v75_v11 }
  0xa1   :  { %v98_v12 = vld [vmem:[#allocation3 + $0x4] sm:$0xf] }
  0xa2   :  { %99 = vst [vmem:[%s153_s1 + $0x4] sm:$0xf] %v98_v12 }

// kernel: factorized_spectral_conv1d_forward.1
= control target key start
LH: loop header
LB: loop body
LE: loop exit
PB: predicated region body
PF: predicated region fallthrough
CT: control target
= control target key end

     0   :  { %vm37_vm0 = vcmask 1043456   ;;  %vm33_vm1 = vcmask 31744   ;;  %vm359_vm2 = vcmask 25600   ;;  %s532_s1 = inlined_call_operand.vmem [shape: f32[2,4,4,4], index: 1, kind: input, shape index: {}]   ;;  %s533_s0 = inlined_call_operand.vmem [shape: f32[2,4,2,4], index: 0, kind: input, shape index: {}]   ;;  %s534_s2 = inlined_call_operand.vmem [shape: f32[2,4,2,4], index: 2, kind: output, shape index: {}]  }
   0x1   :  { %v20_v0 = vld [vmem:[%s532_s1] sm:$0xf]  ;;  %v381_v1 = vld [vmem:[%s532_s1 + $0x10] sm:$0xf]  ;;  %v21_v2 = vld [vmem:[%s532_s1 + $0x4] sm:$0xf] }
   0x2   :  { %385 = vmatpush.msk.msra.mxu0 %vm37_vm0, %v20_v0  ;;  %v382_v3 = vld [vmem:[%s532_s1 + $0x14] sm:$0xf]  ;;  %387 = vmatpush.msk.msra.mxu1 %vm37_vm0, %v21_v2  ;;  %v22_v4 = vld [vmem:[%s532_s1 + $0x8] sm:$0xf]  ;;  %v383_v5 = vld [vmem:[%s532_s1 + $0x18] sm:$0xf]  ;;  %v139_v6 = vsub.f32 %v381_v1, %v20_v0  ;;  %v247_v12 = vadd.f32 %v381_v1, %v20_v0 }
   0x3   :  { %389 = vmatpush.msk.msra.mxu2 %vm37_vm0, %v22_v4  ;;  %v23_v7 = vld [vmem:[%s532_s1 + $0xc] sm:$0xf]  ;;  %v384_v8 = vld [vmem:[%s532_s1 + $0x1c] sm:$0xf]  ;;  %v11_v9 = vld [vmem:[%s533_s0] sm:$0x3]  ;;  %v141_v10 = vsub.f32 %v383_v5, %v22_v4  ;;  %v140_v11 = vsub.f32 %v382_v3, %v21_v2  ;;  %v249_v17 = vadd.f32 %v383_v5, %v22_v4  ;;  %v248_v23 = vadd.f32 %v382_v3, %v21_v2 }
   0x4   :  { %391 = vmatpush.msk.msra.mxu3 %vm37_vm0, %v23_v7  ;;  %v377_v13 = vld [vmem:[%s533_s0 + $0x8] sm:$0x3]  ;;  %v12_v14 = vld [vmem:[%s533_s0 + $0x2] sm:$0x3]  ;;  %v378_v15 = vld [vmem:[%s533_s0 + $0xa] sm:$0x3]  ;;  %v142_v16 = vsub.f32 %v384_v8, %v23_v7  ;;  %393 = vmatpush.msk.msrb.mxu0 %vm37_vm0, %v139_v6  ;;  %v250_v24 = vadd.f32 %v384_v8, %v23_v7 }
   0x5   :  { %v29_v18 = vadd.f32 %v377_v13, %v11_v9  ;;  %v30_v19 = vadd.f32 %v378_v15, %v12_v14  ;;  %v13_v20 = vld [vmem:[%s533_s0 + $0x4] sm:$0x3]  ;;  %v379_v21 = vld [vmem:[%s533_s0 + $0xc] sm:$0x3]  ;;  %v14_v22 = vld [vmem:[%s533_s0 + $0x6] sm:$0x3]  ;;  %397 = vmatpush.msk.msrb.mxu2 %vm37_vm0, %v141_v10  ;;  %395 = vmatpush.msk.msrb.mxu1 %vm37_vm0, %v140_v11 }
   0x6   :  { %v31_v25 = vadd.f32 %v379_v21, %v13_v20  ;;  %v380_v26 = vld [vmem:[%s533_s0 + $0xe] sm:$0x3]  ;;  %399 = vmatpush.msk.msrb.mxu3 %vm37_vm0, %v142_v16 }
   0x7   :  { %386 = vmatmul.msk.f32.vlgmr.msra.gmra.mxu0 %vm33_vm1, %v29_v18  ;;  %388 = vmatmul.msk.f32.vlgmr.msra.gmra.mxu1 %vm33_vm1, %v30_v19  ;;  %v32_v27 = vadd.f32 %v380_v26, %v14_v22 }
   0x8   :  { %390 = vmatmul.msk.f32.vlgmr.msra.gmra.mxu2 %vm33_vm1, %v31_v25  ;;  %401 = vmatpush.msk.msra.mxu0 %vm37_vm0, %v247_v12 }
   0x9   :  { %392 = vmatmul.msk.f32.vlgmr.msra.gmra.mxu3 %vm33_vm1, %v32_v27  ;;  %405 = vmatpush.msk.msra.mxu2 %vm37_vm0, %v249_v17 }
   0xa   :  { %407 = vmatpush.msk.msra.mxu3 %vm37_vm0, %v250_v24  ;;  %403 = vmatpush.msk.msra.mxu1 %vm37_vm0, %v248_v23 }
   0xf   :  { %394 = vmatmul.msk.f32.vlgmr.msrb.gmra.mxu0 %vm33_vm1, %v11_v9  ;;  %396 = vmatmul.msk.f32.vlgmr.msrb.gmra.mxu1 %vm33_vm1, %v12_v14 }
  0x10   :  { %398 = vmatmul.msk.f32.vlgmr.msrb.gmra.mxu2 %vm33_vm1, %v13_v20 }
  0x11   :  { %400 = vmatmul.msk.f32.vlgmr.msrb.gmra.mxu3 %vm33_vm1, %v14_v22 }
  0x17   :  { %402 = vmatmul.msk.f32.vlgmr.msra.gmra.mxu0 %vm33_vm1, %v377_v13  ;;  %404 = vmatmul.msk.f32.vlgmr.msra.gmra.mxu1 %vm33_vm1, %v378_v15 }
  0x18   :  { %406 = vmatmul.msk.f32.vlgmr.msra.gmra.mxu2 %vm33_vm1, %v379_v21 }
  0x19   :  { %408 = vmatmul.msk.f32.vlgmr.msra.gmra.mxu3 %vm33_vm1, %v380_v26 }
  0x84   :  { %v58_v28 = vpop.f32.mrf.mxu0  ;;  %v84_v29 = vpop.f32.mrf.mxu1 }
  0x8b   :  { %v110_v30 = vpop.f32.mrf.mxu2 }
  0x8c   :  { %v136_v31 = vpop.f32.mrf.mxu3  ;;  %v166_v32 = vpop.f32.mrf.mxu0 }
  0x8d   :  { %v364_v33 = vadd.f32 %v166_v32, %v58_v28  ;;  %v192_v34 = vpop.f32.mrf.mxu1 }
  0x8e   :  { %v365_v35 = vadd.f32 %v192_v34, %v84_v29 }
  0x8f   :  { %409 = vst.msk [vmem:[%s534_s2 + $0x8] sm:$0x3] %vm359_vm2, %v364_v33 }
  0x90   :  { %410 = vst.msk [vmem:[%s534_s2 + $0xa] sm:$0x3] %vm359_vm2, %v365_v35 }
  0x93   :  { %v218_v36 = vpop.f32.mrf.mxu2 }
  0x94   :  { %v366_v37 = vadd.f32 %v218_v36, %v110_v30  ;;  %v244_v38 = vpop.f32.mrf.mxu3  ;;  %v274_v39 = vpop.f32.mrf.mxu0 }
  0x95   :  { %v367_v40 = vadd.f32 %v244_v38, %v136_v31  ;;  %v355_v41 = vsub.f32 %v58_v28, %v274_v39  ;;  %v300_v42 = vpop.f32.mrf.mxu1 }
  0x96   :  { %411 = vst.msk [vmem:[%s534_s2 + $0xc] sm:$0x3] %vm359_vm2, %v366_v37  ;;  %v356_v43 = vsub.f32 %v84_v29, %v300_v42 }
  0x97   :  { %412 = vst.msk [vmem:[%s534_s2 + $0xe] sm:$0x3] %vm359_vm2, %v367_v40 }
  0x98   :  { %360 = vst.msk [vmem:[%s534_s2] sm:$0x3] %vm359_vm2, %v355_v41 }
  0x99   :  { %361 = vst.msk [vmem:[%s534_s2 + $0x2] sm:$0x3] %vm359_vm2, %v356_v43 }
  0x9b   :  { %v326_v44 = vpop.f32.mrf.mxu2 }
  0x9c   :  { %v357_v45 = vsub.f32 %v110_v30, %v326_v44  ;;  %v352_v46 = vpop.f32.mrf.mxu3 }
  0x9d   :  { %v358_v47 = vsub.f32 %v136_v31, %v352_v46 }
  0x9e   :  { %362 = vst.msk [vmem:[%s534_s2 + $0x4] sm:$0x3] %vm359_vm2, %v357_v45 }
  0x9f   :  { %363 = vst.msk [vmem:[%s534_s2 + $0x6] sm:$0x3] %vm359_vm2, %v358_v47 }

</bundles_post_ra>
